<compile_context>
chip_gen: v7x
topology: tpu7x:2x2x1
jax: 0.10.0
libtpu: 0.0.40
codegen_flags: <defaults>
</compile_context>

<pallas_src>
import functools
import math

import jax
import jax.numpy as jnp
from jax import lax
from jax.experimental import pallas as pl
from jax.experimental.pallas import tpu as pltpu

_MIB = 1024 * 1024

# Generation-aware tile defaults.
#   per-step arithmetic intensity tm*tn/(tm+tn) must clear the compute/HBM-BW
#   crossover (~240 flop/B v5e, ~685 v6e, ~310 per-TC v7x); v7x has half the VMEM
#   (64 MiB phys / 32 MiB scoped) so tiles + limit are tighter; v5e footprint is
#   kept under its 16 MiB scoped default.
_TILE_CONFIGS = {
    "v5e": dict(tm=512, tn=1024, tk=512, vmem_limit_bytes=None),
    "v6e": dict(tm=1024, tn=2048, tk=1024, vmem_limit_bytes=100 * _MIB),
    "v7x": dict(tm=512, tn=1024, tk=1024, vmem_limit_bytes=48 * _MIB),
    None: dict(tm=512, tn=1024, tk=512, vmem_limit_bytes=64 * _MIB),
}


def _tpu_generation():
    try:
        kind = jax.devices()[0].device_kind.lower()
    except Exception:
        return None
    if "v5 lite" in kind or "v5lite" in kind or "v5e" in kind:
        return "v5e"
    if "v6" in kind or "trillium" in kind:
        return "v6e"
    if "v7" in kind:
        return "v7x"
    return None


def _round_up(x, m):
    return ((x + m - 1) // m) * m


@functools.lru_cache(maxsize=None)
def _make_kernel(k_rem, acc_in_out, compute_dtype):
    """Build the tiled y = x @ W^T + b kernel over grid (M tiles, N tiles, K tiles).

    k_rem:      number of valid K columns in the last k tile (0 => no masking needed)
    acc_in_out: accumulate directly into the resident f32 output block (no scratch)
    """

    def _step(x_ref, w_ref, b_ref, o_ref, acc):
        k = pl.program_id(2)
        nk = pl.num_programs(2)

        @pl.when(k == 0)
        def _():
            acc[...] = jnp.zeros_like(acc)

        x_tile = x_ref[...]
        w_tile = w_ref[...]
        if k_rem:
            # Edge K tile: zero the tail of *both* operands so out-of-bounds
            # garbage (possibly NaN) never enters the reduction — no HBM padding.
            is_last = k == nk - 1
            xcol = lax.broadcasted_iota(jnp.int32, x_tile.shape, 1)
            x_tile = jnp.where(
                jnp.logical_or(jnp.logical_not(is_last), xcol < k_rem), x_tile, 0
            )
            wrow = lax.broadcasted_iota(jnp.int32, w_tile.shape, 0)
            w_tile = jnp.where(
                jnp.logical_or(jnp.logical_not(is_last), wrow < k_rem), w_tile, 0
            )

        # x cast to bf16 in-kernel; W arrives pre-transposed (K, N) and pre-cast,
        # so this is a straight MXU matmul with no per-tile transpose.
        acc[...] += jnp.dot(
            x_tile.astype(compute_dtype),
            w_tile,
            preferred_element_type=jnp.float32,
        )

        @pl.when(k == nk - 1)
        def _():
            # fused bias add: (1, tn) f32 row broadcast over the (tm, tn) accumulator
            o_ref[...] = (acc[...] + b_ref[...]).astype(o_ref.dtype)

    if acc_in_out:

        def kernel(x_ref, w_ref, b_ref, o_ref):
            _step(x_ref, w_ref, b_ref, o_ref, o_ref)

    else:

        def kernel(x_ref, w_ref, b_ref, o_ref, acc_ref):
            _step(x_ref, w_ref, b_ref, o_ref, acc_ref)

    return kernel


def prepare_column_parallel_params(weight, bias, compute_dtype=jnp.bfloat16):
    """One-time parameter prep (do this at load time, NOT per forward call).

    weight: (N, K) torch layout  -> returns (K, N) bf16 RHS (no per-call cast/transpose)
    bias:   (N,)                 -> returns (1, N) f32 row for the fused in-kernel add
    """
    w_t = jnp.asarray(weight).T.astype(compute_dtype)
    b_row = jnp.asarray(bias).reshape(1, -1).astype(jnp.float32)
    return w_t, b_row


def column_parallel_linear(
    x,
    weight_t,
    bias_row,
    *,
    tm=None,
    tn=None,
    tk=None,
    out_dtype=None,
    compute_dtype=jnp.bfloat16,
):
    """x: (B, S, K), weight_t: (K, N) pre-cast bf16, bias_row: (1, N) f32 -> (B, S, N)."""
    B, S, K = x.shape
    Kw, N = weight_t.shape
    assert K == Kw, "weight in_features must match input feature dim"
    assert bias_row.shape == (1, N)
    M = B * S
    out_dtype = jnp.dtype(out_dtype or x.dtype)

    gen = _tpu_generation()
    cfg = _TILE_CONFIGS.get(gen, _TILE_CONFIGS[None])
    tm = tm or cfg["tm"]
    tn = tn or cfg["tn"]
    tk = tk or cfg["tk"]

    # Clamp tiles to full extents for small dims (full-extent blocks are exempt
    # from the (8, 128) alignment rule).
    if M <= tm:
        tm = M
    if N <= tn:
        tn = N

    # v7x has 2 TensorCores: for decode-shaped inputs (single i block) make sure the
    # "parallel" j axis has >= 2 blocks so megacore sharding keeps both TCs busy.
    if gen == "v7x" and M <= tm and tn == N and N >= 256:
        tn = _round_up(pl.cdiv(N, 2), 128)

    # Pick tk so it divides K when possible (no HBM padding, no in-kernel mask);
    # otherwise fall back to masking the K tail inside the kernel on the last step.
    if K <= tk:
        tk = K
        k_rem = 0
    elif K % tk == 0:
        k_rem = 0
    else:
        cand = (tk // 128) * 128
        while cand >= 256 and K % cand != 0:
            cand -= 128
        if cand >= 256 and K % cand == 0:
            tk, k_rem = cand, 0
        else:
            k_rem = K % tk

    # f32 output: accumulate directly into the resident output block (its block
    # index is constant across k), dropping the f32 scratch and halving output VMEM.
    acc_in_out = out_dtype == jnp.dtype(jnp.float32)

    x2d = x.reshape(M, K)  # no cast / no pad in the wrapper: no extra HBM passes
    grid = (pl.cdiv(M, tm), pl.cdiv(N, tn), pl.cdiv(K, tk))

    kernel = _make_kernel(int(k_rem), bool(acc_in_out), compute_dtype)
    scratch_shapes = [] if acc_in_out else [pltpu.VMEM((tm, tn), jnp.float32)]

    out2d = pl.pallas_call(
        kernel,
        out_shape=jax.ShapeDtypeStruct((M, N), out_dtype),
        grid_spec=pltpu.PrefetchScalarGridSpec(
            num_scalar_prefetch=0,
            grid=grid,
            in_specs=[
                pl.BlockSpec((tm, tk), lambda i, j, k: (i, k)),  # x tile (native dtype)
                pl.BlockSpec((tk, tn), lambda i, j, k: (k, j)),  # W^T tile (K, N) bf16
                pl.BlockSpec((1, tn), lambda i, j, k: (0, j)),   # bias row (constant in k)
            ],
            out_specs=pl.BlockSpec((tm, tn), lambda i, j, k: (i, j)),
            scratch_shapes=scratch_shapes,
        ),
        compiler_params=pltpu.CompilerParams(
            dimension_semantics=("parallel", "parallel", "arbitrary"),
            vmem_limit_bytes=cfg["vmem_limit_bytes"],
        ),
    )(x2d, weight_t, bias_row)

    return out2d.reshape(B, S, N)


def init_params(key, in_features, out_features, tp_size=1):
    """Deterministic init mirroring ColumnParallelLinear.reset_parameters."""
    out_per_partition = out_features // tp_size
    kw, kb = jax.random.split(key)
    # kaiming_uniform_(a=sqrt(5)) on (out_per_partition, in_features): bound = 1/sqrt(fan_in)
    fan_in = in_features
    bound = 1.0 / math.sqrt(fan_in)
    weight = jax.random.uniform(
        kw, (out_per_partition, in_features), jnp.float32, -bound, bound
    )
    bias = jax.random.uniform(kb, (out_per_partition,), jnp.float32, -bound, bound)
    return weight, bias


if __name__ == "__main__":
    # tp_size = 1 (default TensorParallelConfig): out_features_per_partition ==
    # out_features and gather_tensor_along_dim(dim=-1) is the identity.
    # TODO(synk): for tp_size > 1, gather_output would be a cross-chip all-gather
    # along -1 (pltpu.make_async_remote_copy ring) and skip_bias_add would return
    # (output, bias); not needed for the default config.
    B, S, in_features, out_features = 2, 8, 32, 64

    key = jax.random.PRNGKey(0)
    kx, kp = jax.random.split(key)
    x = jax.random.normal(kx, (B, S, in_features), dtype=jnp.float32)
    weight, bias = init_params(kp, in_features, out_features)

    # One-time parameter preparation (transposed + bf16 weight, f32 bias row).
    w_t, b_row = prepare_column_parallel_params(weight, bias)

    out = column_parallel_linear(x, w_t, b_row)
    out = jax.block_until_ready(out)

    # reference check in plain JAX at matching (bf16-input, f32-accumulate) precision
    xb = x.astype(jnp.bfloat16).astype(jnp.float32)
    wb = weight.astype(jnp.bfloat16).astype(jnp.float32)
    ref = xb @ wb.T + bias[None, None, :]
    assert out.shape == (B, S, out_features)
    assert jnp.allclose(out, ref, atol=2e-3, rtol=2e-3)

    print("KERNEL_OK")
</pallas_src>

<mosaic_0001>
module attributes {stable_mosaic.version = 11 : i64} {
  func.func @kernel(%arg0: i32, %arg1: i32, %arg2: i32, %arg3: memref<16x32xf32, #tpu.memory_space<vmem>>, %arg4: memref<32x64xbf16, #tpu.memory_space<vmem>>, %arg5: memref<1x64xf32, #tpu.memory_space<vmem>>, %arg6: memref<16x64xf32, #tpu.memory_space<vmem>>) attributes {dimension_semantics = [#tpu.dimension_semantics<parallel>, #tpu.dimension_semantics<parallel>, #tpu.dimension_semantics<arbitrary>], iteration_bounds = array<i64: 1, 1, 1>, scalar_prefetch = 0 : i64, scratch_operands = 0 : i64, tpu.core_type = #tpu.core_type<tc>, window_params = [{transform_indices = @transform_0, window_bounds = array<i64: 16, 32>}, {transform_indices = @transform_1, window_bounds = array<i64: 32, 64>}, {transform_indices = @transform_2, window_bounds = array<i64: 1, 64>}, {transform_indices = @transform_3, window_bounds = array<i64: 16, 64>}]} {
    %c0_i32 = arith.constant 0 : i32
    %0 = arith.cmpi eq, %arg2, %c0_i32 : i32
    %1 = arith.extui %0 : i1 to i32
    %c0_i32_0 = arith.constant 0 : i32
    %2 = arith.cmpi ne, %1, %c0_i32_0 : i32
    scf.if %2 {
      %cst_10 = arith.constant 0.000000e+00 : f32
      %13 = vector.broadcast %cst_10 : f32 to vector<16x64xf32>
      %c0_11 = arith.constant 0 : index
      %c0_12 = arith.constant 0 : index
      %14 = vector.load %arg6[%c0_11, %c0_12] : memref<16x64xf32, #tpu.memory_space<vmem>>, vector<16x64xf32>
      tpu.vector_store %arg6[%c0_11, %c0_12], %13 {strides = array<i32>} : memref<16x64xf32, #tpu.memory_space<vmem>>, vector<16x64xf32>,
    } else {
    }
    %c0 = arith.constant 0 : index
    %c0_1 = arith.constant 0 : index
    %3 = vector.load %arg3[%c0, %c0_1] : memref<16x32xf32, #tpu.memory_space<vmem>>, vector<16x32xf32>
    %c0_2 = arith.constant 0 : index
    %c0_3 = arith.constant 0 : index
    %4 = vector.load %arg4[%c0_2, %c0_3] : memref<32x64xbf16, #tpu.memory_space<vmem>>, vector<32x64xbf16>
    %c0_4 = arith.constant 0 : index
    %c0_5 = arith.constant 0 : index
    %5 = vector.load %arg6[%c0_4, %c0_5] : memref<16x64xf32, #tpu.memory_space<vmem>>, vector<16x64xf32>
    %6 = arith.truncf %3 : vector<16x32xf32> to vector<16x32xbf16>
    %cst = arith.constant dense<0.000000e+00> : vector<16x64xf32>
    %7 = tpu.matmul %6, %4, %cst {dimension_numbers = #tpu.dot_dimension_numbers<[1], [0], [0], [1], [0, 0, 1, 1], [], []>} : vector<16x32xbf16>, vector<32x64xbf16>, vector<16x64xf32> -> vector<16x64xf32>
    %8 = arith.addf %5, %7 : vector<16x64xf32>
    %c0_6 = arith.constant 0 : index
    %c0_7 = arith.constant 0 : index
    %9 = vector.load %arg6[%c0_6, %c0_7] : memref<16x64xf32, #tpu.memory_space<vmem>>, vector<16x64xf32>
    tpu.vector_store %arg6[%c0_6, %c0_7], %8 {strides = array<i32>} : memref<16x64xf32, #tpu.memory_space<vmem>>, vector<16x64xf32>,
    %c0_i32_8 = arith.constant 0 : i32
    %10 = arith.cmpi eq, %arg2, %c0_i32_8 : i32
    %11 = arith.extui %10 : i1 to i32
    %c0_i32_9 = arith.constant 0 : i32
    %12 = arith.cmpi ne, %11, %c0_i32_9 : i32
    scf.if %12 {
      %c0_10 = arith.constant 0 : index
      %c0_11 = arith.constant 0 : index
      %13 = vector.load %arg6[%c0_10, %c0_11] : memref<16x64xf32, #tpu.memory_space<vmem>>, vector<16x64xf32>
      %c0_12 = arith.constant 0 : index
      %c0_13 = arith.constant 0 : index
      %14 = vector.load %arg5[%c0_12, %c0_13] : memref<1x64xf32, #tpu.memory_space<vmem>>, vector<1x64xf32>
      %15 = vector.broadcast %14 : vector<1x64xf32> to vector<16x64xf32>
      %16 = arith.addf %13, %15 : vector<16x64xf32>
      %c0_14 = arith.constant 0 : index
      %c0_15 = arith.constant 0 : index
      %17 = vector.load %arg6[%c0_14, %c0_15] : memref<16x64xf32, #tpu.memory_space<vmem>>, vector<16x64xf32>
      tpu.vector_store %arg6[%c0_14, %c0_15], %16 {strides = array<i32>} : memref<16x64xf32, #tpu.memory_space<vmem>>, vector<16x64xf32>,
    } else {
    }
    return
  }
  func.func @transform_0(%arg0: i32, %arg1: i32, %arg2: i32) -> (i32, i32) {
    %c0_i32 = arith.constant 0 : i32
    return %arg0, %arg2 : i32, i32
  }
  func.func @transform_1(%arg0: i32, %arg1: i32, %arg2: i32) -> (i32, i32) {
    %c0_i32 = arith.constant 0 : i32
    return %arg2, %arg1 : i32, i32
  }
  func.func @transform_2(%arg0: i32, %arg1: i32, %arg2: i32) -> (i32, i32) {
    %c0_i32 = arith.constant 0 : i32
    %c0_i32_0 = arith.constant 0 : i32
    return %c0_i32, %arg1 : i32, i32
  }
  func.func @transform_3(%arg0: i32, %arg1: i32, %arg2: i32) -> (i32, i32) {
    %c0_i32 = arith.constant 0 : i32
    return %arg0, %arg1 : i32, i32
  }
}

</mosaic_0001>

<bundles_post_ra>
// kernel: tpu_custom_call.1
= control target key start
LH: loop header
LB: loop body
LE: loop exit
PB: predicated region body
PF: predicated region fallthrough
CT: control target
= control target key end

     0   :  { %8 = vsyncpa [#allocation3], 0  ;;  %s378_s0 = inlined_call_operand.hbm [shape: f32[16,32], index: 0, kind: input, shape index: {}]   ;;  %s379_s1 = inlined_call_operand.hbm [shape: bf16[32,64], index: 1, kind: input, shape index: {}]   ;;  %s380_s2 = inlined_call_operand.hbm [shape: f32[1,64], index: 2, kind: input, shape index: {}]   ;;  %s381_s3 = inlined_call_operand.hbm [shape: f32[16,64], index: 3, kind: output, shape index: {}]  }
   0x1   :  { %9 = vsyncpa [#allocation6], 0 }
   0x2   :  { %10 = vsyncpa [#allocation4], 0  ;;  %s288_s12 = smov [#allocation5]   ;;  %s194_s16 = scalar_lea.hbm %s379_s1, 256 }
   0x3   :  { %s28_s13 = sshll.u32 %s288_s12, 4  ;;  %p195_p0 = scmp.ne.s32.totalorder %s379_s1, %s194_s16  ;;  %s29_s13 = int_to_ptr.vmem [resolvable:$true] %s28_s13 }
   0x4   :  { %p198_p1 = scmp.lt.u32.totalorder %s194_s16, %s379_s1 }
   0x6   :  { %p200_p2 = pnand %p198_p1, %p195_p0 }
   0x8   :  { %203 = shalt.err (!%p200_p2)
}
   0x9   :  { %s204_s21 = scalar_lea.vmem %s29_s13, 256  ;;  %p209_p4 = scmp.lt.s32.totalorder %s29_s13, %s29_s13 }
   0xa   :  { %p205_p3 = scmp.ne.s32.totalorder %s29_s13, %s204_s21  ;;  %p210_p5 = scmp.lt.s32.totalorder %s204_s21, %s204_s21 }
   0xc   :  { %p211_p6 = por %p210_p5, %p209_p4 }
   0xe   :  { %p212_p7 = pnand %p211_p6, %p205_p3 }
  0x10   :  { %215 = shalt.err (!%p212_p7)
}
  0x11   :  { %s289_s22 = smov 64   ;;  %s290_s23 = smov 4  }
  0x12   :  { %34 = dma.hbm_to_vmem [thread:$0]  %s379_s1, 256, %s29_s13, [#allocation6], %s289_s22, %s289_s22, %s290_s23  }
  0x13   :  { %s291_s26 = smov [#allocation2]   ;;  %s216_s30 = scalar_lea.hbm %s378_s0, 256 }
  0x14   :  { %s16_s27 = sshll.u32 %s291_s26, 4  ;;  %p217_p8 = scmp.ne.s32.totalorder %s378_s0, %s216_s30  ;;  %s17_s27 = int_to_ptr.vmem [resolvable:$true] %s16_s27 }
  0x15   :  { %p220_p9 = scmp.lt.u32.totalorder %s216_s30, %s378_s0 }
  0x17   :  { %p222_p10 = pnand %p220_p9, %p217_p8 }
  0x19   :  { %225 = shalt.err (!%p222_p10)
}
  0x1a   :  { %s226_s8 = scalar_lea.vmem %s17_s27, 256  ;;  %p231_p12 = scmp.lt.s32.totalorder %s17_s27, %s17_s27 }
  0x1b   :  { %p227_p11 = scmp.ne.s32.totalorder %s17_s27, %s226_s8  ;;  %p232_p13 = scmp.lt.s32.totalorder %s226_s8, %s226_s8 }
  0x1d   :  { %p233_p0 = por %p232_p13, %p231_p12 }
  0x1f   :  { %p234_p1 = pnand %p233_p0, %p227_p11 }
  0x21   :  { %237 = shalt.err (!%p234_p1)
}
  0x22   :  { %s292_s1 = smov 128   ;;  %s293_s9 = smov 8  }
  0x23   :  { %22 = dma.hbm_to_vmem [thread:$0]  %s378_s0, 256, %s17_s27, [#allocation3], %s292_s1, %s292_s1, %s293_s9  }
  0x24   :  { %s294_s12 = smov [#allocation7]   ;;  %s238_s16 = scalar_lea.hbm %s380_s2, 16 }
  0x25   :  { %s41_s13 = sshll.u32 %s294_s12, 4  ;;  %p239_p2 = scmp.ne.s32.totalorder %s380_s2, %s238_s16  ;;  %s42_s13 = int_to_ptr.vmem [resolvable:$true] %s41_s13 }
  0x26   :  { %p242_p3 = scmp.lt.u32.totalorder %s238_s16, %s380_s2 }
  0x28   :  { %p244_p4 = pnand %p242_p3, %p239_p2 }
  0x2a   :  { %247 = shalt.err (!%p244_p4)
}
  0x2b   :  { %s248_s21 = scalar_lea.vmem %s42_s13, 16  ;;  %s252_s0 = scalar_lea.vmem %s42_s13, 32 }
  0x2c   :  { %p249_p5 = scmp.ne.s32.totalorder %s42_s13, %s248_s21  ;;  %p253_p6 = scmp.lt.s32.totalorder %s42_s13, %s42_s13 }
  0x2d   :  { %p254_p7 = scmp.lt.s32.totalorder %s252_s0, %s248_s21 }
  0x2f   :  { %p255_p8 = por %p254_p7, %p253_p6 }
  0x31   :  { %p256_p9 = pnand %p255_p8, %p249_p5 }
  0x33   :  { %259 = shalt.err (!%p256_p9)
}
  0x34   :  { %44 = dma.hbm_to_vmem [thread:$0]  %s380_s2, 16, %s42_s13, [#allocation6]  }
  0x35   :  { %282 = dma.done.wait [#allocation3], 256  }
  0x36   :  { %283 = vsyncadd [#allocation3], 4294967040 }
  0x37   :  { %284 = dma.done.wait [#allocation6], 272  }
  0x38   :  { %285 = vsyncadd [#allocation6], 4294967024  ;;  %vm59_vm0 = vcmask 523264   ;;  %v295_v0 = vmov 0.0   ;;  %vm296_vm1 = vmmov 0   ;;  %v192_v1 = vld [vmem:[#allocation5] sm:$0xff]  }
  0x39   :  { %60 = vst.msk [vmem:[#allocation8] sm:$0xff] %vm59_vm0, %v295_v0  ;;  %61 = vst.msk [vmem:[#allocation8 + $0x8] sm:$0xff] %vm59_vm0, %v295_v0  ;;  %174 = vmatprep.subr.bf16.mxu0 %v295_v0  ;;  %178 = vmatprep.mubr.msk.bf16.mxu0 %vm296_vm1, %v295_v0  ;;  %v193_v2 = vld [vmem:[#allocation5 + $0x8] sm:$0xff]   ;;  %v62_v3 = vld [vmem:[#allocation2] sm:$0xff]  ;;  %vm83_vm2 = vcmask 261120   ;;  %s297_s2 = smov [#allocation8]  }
  0x3a   :  { %175 = vmatpush3.bf16.msra.mxu0 %v192_v1  ;;  %v63_v4 = vld [vmem:[#allocation2 + $0x8] sm:$0xff]  ;;  %v170_v14 = vld [vmem:[#allocation7] ss:$0 sm:$0xff]  ;;  %s154_s24 = sshll.u32 %s297_s2, 4  ;;  %s155_s24 = int_to_ptr.vmem [resolvable:$true] %s154_s24 }
  0x3b   :  { %176 = vmatprep.subr.bf16.mxu0 %v295_v0  ;;  %v70_v5 = vpack.c.bf16 %v63_v4, %v62_v3  ;;  %s260_s25 = scalar_lea.vmem %s155_s24, 256  ;;  %p265_p11 = scmp.lt.s32.totalorder %s155_s24, %s155_s24 }
  0x3c   :  { %p261_p10 = scmp.ne.s32.totalorder %s155_s24, %s260_s25  ;;  %p266_p12 = scmp.lt.s32.totalorder %s260_s25, %s260_s25 }
  0x3e   :  { %177 = vmatpush3.bf16.msra.mxu0 %v193_v2  ;;  %p267_p13 = por %p266_p12, %p265_p11 }
  0x40   :  { %v68_v6 = vld [vmem:[#allocation8] sm:$0xff]  ;;  %v69_v8 = vld [vmem:[#allocation8 + $0x8] sm:$0xff]  ;;  %p268_p0 = pnand %p267_p13, %p261_p10 }
  0x41   :  { %179 = vmatmul.mubr.msk.bf16.vlgmr.msra.gmra.mrb[0].mxu0 %vm83_vm2, %v70_v5 }
 0x114   :  { %v121_v7 = vpop.f32.mrb[0].mxu0 }
 0x115   :  { %v128_v9 = vadd.f32 %v121_v7, %v68_v6  ;;  %v180_v10 = vpop.f32.mrb[1].mxu0 }
 0x116   :  { %v124_v11 = vpop.f32.mrb[2].mxu0 }
 0x117   :  { %131 = vst.msk [vmem:[#allocation8] sm:$0xff] %vm59_vm0, %v128_v9  ;;  %v129_v12 = vadd.f32 %v124_v11, %v69_v8  ;;  %v181_v13 = vpop.f32.mrb[3].mxu0 }
 0x119   :  { %132 = vst.msk [vmem:[#allocation8 + $0x8] sm:$0xff] %vm59_vm0, %v129_v12 }
 0x11e   :  { %v136_v15 = vld [vmem:[#allocation8] sm:$0xff] }
 0x11f   :  { %v145_v16 = vadd.f32 %v170_v14, %v136_v15 }
 0x120   :  { %v137_v17 = vld [vmem:[#allocation8 + $0x8] sm:$0xff] }
 0x121   :  { %v146_v18 = vadd.f32 %v170_v14, %v137_v17  ;;  %147 = vst.msk [vmem:[#allocation8] sm:$0xff] %vm59_vm0, %v145_v16 }
 0x123   :  { %148 = vst.msk [vmem:[#allocation8 + $0x8] sm:$0xff] %vm59_vm0, %v146_v18 }
 0x124   :  { %271 = shalt.err (!%p268_p0)
}
 0x125   :  { %s272_s28 = scalar_lea.hbm %s381_s3, 256 }
 0x126   :  { %p273_p1 = scmp.ne.s32.totalorder %s381_s3, %s272_s28  ;;  %p276_p2 = scmp.lt.u32.totalorder %s272_s28, %s381_s3 }
 0x128   :  { %p278_p3 = pnand %p276_p2, %p273_p1 }
 0x12a   :  { %281 = shalt.err (!%p278_p3)
}
 0x12b   :  { %160 = dma.vmem_to_hbm [thread:$0]  %s155_s24, 256, %s381_s3, [#allocation4], %s292_s1, %s292_s1, %s293_s9  }
 0x12c   :  { %286 = dma.done.wait [#allocation4], 256  }
 0x12d   :  { %287 = vsyncadd [#allocation4], 4294967040 }
 0x12e   :  { %164 = vsyncpa [#allocation3], 1 }
 0x12f   :  { %165 = vsyncpa [#allocation6], 1 }
 0x130   :  { %166 = vsyncpa [#allocation4], 1 }

</bundles_post_ra>
